<compile_context>
chip_gen: v7x
topology: tpu7x:2x2x1
jax: 0.10.0
libtpu: 0.0.40
codegen_flags: <defaults>
</compile_context>

<pallas_src>
import jax
import jax.numpy as jnp
from jax.experimental import pallas as pl
from jax.experimental.pallas import tpu as pltpu

H1 = 128
H2 = 256


def _round_up(x, m):
    return ((x + m - 1) // m) * m


def critic_kernel(x_ref, w1_ref, b1_ref, w2_ref, b2_ref, w3_ref, b3_ref, o_ref):
    # Layer 1: (TB, S) @ (S, 128) in f32 on the MXU (exact inputs; the K dim
    # is left unpadded and Mosaic handles the sub-128 contraction), then
    # bias + relu on the VPU.
    h1 = jnp.dot(x_ref[...], w1_ref[...], preferred_element_type=jnp.float32)
    h1 = jnp.maximum(h1 + b1_ref[...], 0.0)
    # Layer 2: (TB, 128) @ (128, 256) with bf16 operands (full MXU rate) and
    # f32 accumulation.  The h1 cast is a free VPU op under the matmuls/DMA.
    h2 = jnp.dot(h1.astype(w2_ref.dtype), w2_ref[...],
                 preferred_element_type=jnp.float32)
    h2 = jnp.maximum(h2 + b2_ref[...], 0.0)
    # Layer 3 (out_features == 1): VPU multiply + lane reduction against the
    # (1, 256) weight row; scalar bias read from SMEM.
    # TODO(synk): a lane-dense (1, TB) output row would avoid the masked
    # (TB, 1) column stores, but requires a sublane->lane relayout of the
    # per-row scalars; kept on the known-good column-store lowering.
    v = jnp.sum(h2 * w3_ref[...], axis=-1, keepdims=True) + b3_ref[0, 0]
    o_ref[...] = v.astype(o_ref.dtype)


def critic_forward(x, params, *, block_batch=2048):
    """x: (B, state_size) f32.  params: dict of pre-transposed weights/biases."""
    w1, b1, w2, b2, w3, b3 = (
        params["w1"], params["b1"], params["w2"],
        params["b2"], params["w3"], params["b3"],
    )
    B, S = x.shape
    assert w1.shape == (S, H1) and w2.shape == (H1, H2)
    assert w3.shape == (1, H2) and b3.shape == (1, 1)

    # Balanced batch tiling: even-sized tiles (an unlucky B never ~doubles the
    # padded work), >= 2 tiles for large B so both v7x TensorCores stay busy,
    # TB a multiple of 16 for the bf16 layer-2 operands.
    n_tiles = max(1, (B + block_batch - 1) // block_batch)
    if n_tiles == 1 and B >= 2048:
        n_tiles = 2
    mult = 16 if B >= 16 else 8
    TB = _round_up((B + n_tiles - 1) // n_tiles, mult)
    B_pad = n_tiles * TB

    # x goes in unpadded/un-cast whenever B divides evenly; the zero-pad below
    # only triggers for ragged batch sizes (and adds < TB rows).
    if B_pad != B:
        x = jnp.pad(x, ((0, B_pad - B), (0, 0)))

    w2c = w2.astype(jnp.bfloat16)   # tiny one-time cast (128x256)

    # Constant block index -> weights/biases DMA'd once, VMEM-resident.
    const2 = lambda shape: pl.BlockSpec(shape, lambda i: (0, 0))

    out = pl.pallas_call(
        critic_kernel,
        out_shape=jax.ShapeDtypeStruct((B_pad, 1), jnp.float32),
        grid=(n_tiles,),
        in_specs=[
            pl.BlockSpec((TB, S), lambda i: (i, 0)),               # x (tiled)
            const2((S, H1)), const2((1, H1)),                      # w1, b1
            const2((H1, H2)), const2((1, H2)),                     # w2, b2
            const2((1, H2)),                                       # w3 row
            pl.BlockSpec(memory_space=pltpu.MemorySpace.SMEM),     # b3 scalar
        ],
        out_specs=pl.BlockSpec((TB, 1), lambda i: (i, 0)),
        compiler_params=pltpu.CompilerParams(
            dimension_semantics=("parallel",)),
    )(x, w1, b1, w2c, b2, w3, b3)
    return out[:B]


def init_params(key, state_size):
    """Deterministic init matching nn.Linear's uniform(-1/sqrt(fan_in), ...).
    PyTorch weight is (out, in); we store the transpose (in, out) for layers
    1-2 so the kernel does x @ W, and layer 3's weight as a (1, 256) row."""
    ks = jax.random.split(key, 6)

    def uniform(k, shape, fan_in):
        bound = 1.0 / jnp.sqrt(fan_in)
        return jax.random.uniform(k, shape, jnp.float32, -bound, bound)

    return {
        "w1": uniform(ks[0], (state_size, H1), state_size),
        "b1": uniform(ks[1], (1, H1), state_size),
        "w2": uniform(ks[2], (H1, H2), H1),
        "b2": uniform(ks[3], (1, H2), H1),
        "w3": uniform(ks[4], (1, H2), H2),   # row vector for the reduction head
        "b3": uniform(ks[5], (1, 1), H2),
    }


def reference_forward(x, params):
    h1 = jnp.maximum(x @ params["w1"] + params["b1"], 0.0)
    h2 = jnp.maximum(h1 @ params["w2"] + params["b2"], 0.0)
    return h2 @ params["w3"].T + params["b3"]


if __name__ == "__main__":
    key = jax.random.PRNGKey(0)
    k_param, k_x = jax.random.split(key)

    batch = 8
    state_size = 32          # small RL-style state vector
    # action_size is unused by Critic.forward (matches the PyTorch module).

    params = init_params(k_param, state_size)
    x = jax.random.normal(k_x, (batch, state_size), jnp.float32)

    value = critic_forward(x, params)
    value = jax.block_until_ready(value)

    ref = reference_forward(x, params)
    assert value.shape == (batch, 1)
    # Layer-1 is exact f32; only the layer-2 matmul uses bf16 operands with
    # f32 accumulation -> tighter tolerance than the previous revision.
    assert jnp.allclose(value, ref, atol=2e-2, rtol=2e-2)

    print("KERNEL_OK")
</pallas_src>

<mosaic_0001>
module attributes {stable_mosaic.version = 11 : i64} {
  func.func @critic_kernel(%arg0: i32, %arg1: memref<8x32xf32, #tpu.memory_space<vmem>>, %arg2: memref<32x128xf32, #tpu.memory_space<vmem>>, %arg3: memref<1x128xf32, #tpu.memory_space<vmem>>, %arg4: memref<128x256xbf16, #tpu.memory_space<vmem>>, %arg5: memref<1x256xf32, #tpu.memory_space<vmem>>, %arg6: memref<1x256xf32, #tpu.memory_space<vmem>>, %arg7: memref<1x1xf32, #tpu.memory_space<smem>>, %arg8: memref<8x1xf32, #tpu.memory_space<vmem>>) attributes {dimension_semantics = [#tpu.dimension_semantics<parallel>], iteration_bounds = array<i64: 1>, scalar_prefetch = 0 : i64, scratch_operands = 0 : i64, tpu.core_type = #tpu.core_type<tc>, window_params = [{transform_indices = @transform_0, window_bounds = array<i64: 8, 32>}, {pipeline_mode = #tpu.pipeline_mode<synchronous>, transform_indices = @transform_1, window_bounds = array<i64: 32, 128>}, {pipeline_mode = #tpu.pipeline_mode<synchronous>, transform_indices = @transform_2, window_bounds = array<i64: 1, 128>}, {pipeline_mode = #tpu.pipeline_mode<synchronous>, transform_indices = @transform_3, window_bounds = array<i64: 128, 256>}, {pipeline_mode = #tpu.pipeline_mode<synchronous>, transform_indices = @transform_4, window_bounds = array<i64: 1, 256>}, {pipeline_mode = #tpu.pipeline_mode<synchronous>, transform_indices = @transform_5, window_bounds = array<i64: 1, 256>}, {transform_indices = @transform_6, window_bounds = array<i64: 1, 1>}, {transform_indices = @transform_7, window_bounds = array<i64: 8, 1>}]} {
    %c0 = arith.constant 0 : index
    %c0_0 = arith.constant 0 : index
    %0 = vector.load %arg1[%c0, %c0_0] : memref<8x32xf32, #tpu.memory_space<vmem>>, vector<8x32xf32>
    %c0_1 = arith.constant 0 : index
    %c0_2 = arith.constant 0 : index
    %1 = vector.load %arg2[%c0_1, %c0_2] : memref<32x128xf32, #tpu.memory_space<vmem>>, vector<32x128xf32>
    %cst = arith.constant dense<0.000000e+00> : vector<8x128xf32>
    %2 = tpu.matmul %0, %1, %cst {dimension_numbers = #tpu.dot_dimension_numbers<[1], [0], [0], [1], [0, 0, 1, 1], [], []>} : vector<8x32xf32>, vector<32x128xf32>, vector<8x128xf32> -> vector<8x128xf32>
    %c0_3 = arith.constant 0 : index
    %c0_4 = arith.constant 0 : index
    %3 = vector.load %arg3[%c0_3, %c0_4] : memref<1x128xf32, #tpu.memory_space<vmem>>, vector<1x128xf32>
    %4 = vector.broadcast %3 : vector<1x128xf32> to vector<8x128xf32>
    %5 = arith.addf %2, %4 : vector<8x128xf32>
    %cst_5 = arith.constant 0.000000e+00 : f32
    %6 = vector.broadcast %cst_5 : f32 to vector<8x128xf32>
    %7 = arith.maximumf %5, %6 : vector<8x128xf32>
    %8 = arith.truncf %7 : vector<8x128xf32> to vector<8x128xbf16>
    %c0_6 = arith.constant 0 : index
    %c0_7 = arith.constant 0 : index
    %9 = vector.load %arg4[%c0_6, %c0_7] : memref<128x256xbf16, #tpu.memory_space<vmem>>, vector<128x256xbf16>
    %cst_8 = arith.constant dense<0.000000e+00> : vector<8x256xf32>
    %10 = tpu.matmul %8, %9, %cst_8 {dimension_numbers = #tpu.dot_dimension_numbers<[1], [0], [0], [1], [0, 0, 1, 1], [], []>} : vector<8x128xbf16>, vector<128x256xbf16>, vector<8x256xf32> -> vector<8x256xf32>
    %c0_9 = arith.constant 0 : index
    %c0_10 = arith.constant 0 : index
    %11 = vector.load %arg5[%c0_9, %c0_10] : memref<1x256xf32, #tpu.memory_space<vmem>>, vector<1x256xf32>
    %12 = vector.broadcast %11 : vector<1x256xf32> to vector<8x256xf32>
    %13 = arith.addf %10, %12 : vector<8x256xf32>
    %cst_11 = arith.constant 0.000000e+00 : f32
    %14 = vector.broadcast %cst_11 : f32 to vector<8x256xf32>
    %15 = arith.maximumf %13, %14 : vector<8x256xf32>
    %c0_12 = arith.constant 0 : index
    %c0_13 = arith.constant 0 : index
    %16 = vector.load %arg6[%c0_12, %c0_13] : memref<1x256xf32, #tpu.memory_space<vmem>>, vector<1x256xf32>
    %17 = vector.broadcast %16 : vector<1x256xf32> to vector<8x256xf32>
    %18 = arith.mulf %15, %17 : vector<8x256xf32>
    %cst_14 = arith.constant dense<0.000000e+00> : vector<8xf32>
    %19 = vector.multi_reduction <add>, %18, %cst_14 [1] : vector<8x256xf32> to vector<8xf32>
    %20 = vector.shape_cast %19 : vector<8xf32> to vector<8x1xf32>
    %c0_15 = arith.constant 0 : index
    %c0_16 = arith.constant 0 : index
    %21 = memref.load %arg7[%c0_15, %c0_16] : memref<1x1xf32, #tpu.memory_space<smem>>
    %22 = vector.broadcast %21 : f32 to vector<8x1xf32>
    %23 = arith.addf %20, %22 : vector<8x1xf32>
    %c0_17 = arith.constant 0 : index
    %c0_18 = arith.constant 0 : index
    %24 = vector.load %arg8[%c0_17, %c0_18] : memref<8x1xf32, #tpu.memory_space<vmem>>, vector<8x1xf32>
    tpu.vector_store %arg8[%c0_17, %c0_18], %23 {strides = array<i32>} : memref<8x1xf32, #tpu.memory_space<vmem>>, vector<8x1xf32>,
    return
  }
  func.func @transform_0(%arg0: i32) -> (i32, i32) {
    %c0_i32 = arith.constant 0 : i32
    %c0_i32_0 = arith.constant 0 : i32
    return %arg0, %c0_i32 : i32, i32
  }
  func.func @transform_1(%arg0: i32) -> (i32, i32) {
    %c0_i32 = arith.constant 0 : i32
    %c0_i32_0 = arith.constant 0 : i32
    %c0_i32_1 = arith.constant 0 : i32
    return %c0_i32, %c0_i32_0 : i32, i32
  }
  func.func @transform_2(%arg0: i32) -> (i32, i32) {
    %c0_i32 = arith.constant 0 : i32
    %c0_i32_0 = arith.constant 0 : i32
    %c0_i32_1 = arith.constant 0 : i32
    return %c0_i32, %c0_i32_0 : i32, i32
  }
  func.func @transform_3(%arg0: i32) -> (i32, i32) {
    %c0_i32 = arith.constant 0 : i32
    %c0_i32_0 = arith.constant 0 : i32
    %c0_i32_1 = arith.constant 0 : i32
    return %c0_i32, %c0_i32_0 : i32, i32
  }
  func.func @transform_4(%arg0: i32) -> (i32, i32) {
    %c0_i32 = arith.constant 0 : i32
    %c0_i32_0 = arith.constant 0 : i32
    %c0_i32_1 = arith.constant 0 : i32
    return %c0_i32, %c0_i32_0 : i32, i32
  }
  func.func @transform_5(%arg0: i32) -> (i32, i32) {
    %c0_i32 = arith.constant 0 : i32
    %c0_i32_0 = arith.constant 0 : i32
    %c0_i32_1 = arith.constant 0 : i32
    return %c0_i32, %c0_i32_0 : i32, i32
  }
  func.func @transform_6(%arg0: i32) -> (i32, i32) {
    %c0_i32 = arith.constant 0 : i32
    %c0_i32_0 = arith.constant 0 : i32
    %c0_i32_1 = arith.constant 0 : i32
    return %c0_i32, %c0_i32_0 : i32, i32
  }
  func.func @transform_7(%arg0: i32) -> (i32, i32) {
    %c0_i32 = arith.constant 0 : i32
    %c0_i32_0 = arith.constant 0 : i32
    return %arg0, %c0_i32 : i32, i32
  }
}

</mosaic_0001>

<bundles_post_ra>
// kernel: tpu_custom_call.1
= control target key start
LH: loop header
LB: loop body
LE: loop exit
PB: predicated region body
PF: predicated region fallthrough
CT: control target
= control target key end

     0   :  { %13 = vsyncpa [#allocation4], 0  ;;  %s583_s0 = inlined_call_operand.hbm [shape: f32[8,32], index: 0, kind: input, shape index: {}]   ;;  %s584_s1 = inlined_call_operand.hbm [shape: f32[32,128], index: 1, kind: input, shape index: {}]   ;;  %s585_s2 = inlined_call_operand.vmem [shape: f32[1,128], index: 2, kind: input, shape index: {}]   ;;  %s586_s3 = inlined_call_operand.hbm [shape: bf16[128,256], index: 3, kind: input, shape index: {}]   ;;  %s587_s4 = inlined_call_operand.vmem [shape: f32[1,256], index: 4, kind: input, shape index: {}]   ;;  %s588_s5 = inlined_call_operand.vmem [shape: f32[1,256], index: 5, kind: input, shape index: {}]   ;;  %s589_s6 = inlined_call_operand.<no memory space> [shape: f32[1,1], index: 6, kind: input, shape index: {}]   ;;  %s590_s7 = inlined_call_operand.vmem [shape: f32[8,1], index: 7, kind: output, shape index: {}]  }
   0x1   :  { %14 = vsyncpa [#allocation6], 0  ;;  %s477_s24 = smov [#allocation5]   ;;  %s407_s28 = scalar_lea.hbm %s584_s1, 512 }
   0x2   :  { %s30_s25 = sshll.u32 %s477_s24, 4  ;;  %p408_p0 = scmp.ne.s32.totalorder %s584_s1, %s407_s28  ;;  %s31_s25 = int_to_ptr.vmem [resolvable:$true] %s30_s25 }
   0x3   :  { %p411_p1 = scmp.lt.u32.totalorder %s407_s28, %s584_s1 }
   0x5   :  { %p413_p2 = pnand %p411_p1, %p408_p0 }
   0x7   :  { %416 = shalt.err (!%p413_p2)
}
   0x8   :  { %s417_s10 = scalar_lea.vmem %s31_s25, 512  ;;  %p422_p4 = scmp.lt.s32.totalorder %s31_s25, %s31_s25 }
   0x9   :  { %p418_p3 = scmp.ne.s32.totalorder %s31_s25, %s417_s10  ;;  %p423_p5 = scmp.lt.s32.totalorder %s417_s10, %s417_s10 }
   0xb   :  { %p424_p6 = por %p423_p5, %p422_p4 }
   0xd   :  { %p425_p7 = pnand %p424_p6, %p418_p3 }
   0xf   :  { %428 = shalt.err (!%p425_p7)
}
  0x10   :  { %s478_s11 = smov 128   ;;  %s479_s12 = smov 8  }
  0x11   :  { %36 = dma.hbm_to_vmem [thread:$0]  %s584_s1, 512, %s31_s25, [#allocation6], %s478_s11, %s478_s11, %s479_s12  }
  0x12   :  { %s480_s15 = smov [#allocation3]   ;;  %s481_s17 = smov [#allocation7]  }
  0x13   :  { %s21_s16 = sshll.u32 %s480_s15, 4  ;;  %s44_s18 = sshll.u32 %s481_s17, 4  ;;  %s22_s16 = int_to_ptr.vmem [resolvable:$true] %s21_s16  ;;  %s45_s18 = int_to_ptr.vmem [resolvable:$true] %s44_s18 }
  0x14   :  { %s429_s21 = scalar_lea.hbm %s583_s0, 128 }
  0x15   :  { %p430_p8 = scmp.ne.s32.totalorder %s583_s0, %s429_s21  ;;  %p433_p9 = scmp.lt.u32.totalorder %s429_s21, %s583_s0 }
  0x17   :  { %p435_p10 = pnand %p433_p9, %p430_p8 }
  0x19   :  { %438 = shalt.err (!%p435_p10)
}
  0x1a   :  { %s439_s1 = scalar_lea.vmem %s22_s16, 128  ;;  %p444_p12 = scmp.lt.s32.totalorder %s22_s16, %s22_s16 }
  0x1b   :  { %p440_p11 = scmp.ne.s32.totalorder %s22_s16, %s439_s1  ;;  %p445_p13 = scmp.lt.s32.totalorder %s439_s1, %s439_s1 }
  0x1d   :  { %p446_p0 = por %p445_p13, %p444_p12 }
  0x1f   :  { %p447_p1 = pnand %p446_p0, %p440_p11 }
  0x21   :  { %450 = shalt.err (!%p447_p1)
}
  0x22   :  { %24 = dma.hbm_to_vmem [thread:$0]  %s583_s0, 128, %s22_s16, [#allocation4]  }
  0x23   :  { %s451_s30 = scalar_lea.hbm %s586_s3, 2048 }
  0x24   :  { %p452_p2 = scmp.ne.s32.totalorder %s586_s3, %s451_s30  ;;  %p455_p3 = scmp.lt.u32.totalorder %s451_s30, %s586_s3 }
  0x26   :  { %p457_p4 = pnand %p455_p3, %p452_p2 }
  0x28   :  { %460 = shalt.err (!%p457_p4)
}
  0x29   :  { %s461_s14 = scalar_lea.vmem %s45_s18, 2048  ;;  %p466_p6 = scmp.lt.s32.totalorder %s45_s18, %s45_s18 }
  0x2a   :  { %p462_p5 = scmp.ne.s32.totalorder %s45_s18, %s461_s14  ;;  %p467_p7 = scmp.lt.s32.totalorder %s461_s14, %s461_s14 }
  0x2c   :  { %p468_p8 = por %p467_p7, %p466_p6 }
  0x2e   :  { %p469_p9 = pnand %p468_p8, %p462_p5 }
  0x30   :  { %472 = shalt.err (!%p469_p9)
}
  0x31   :  { %50 = dma.hbm_to_vmem [thread:$0]  %s586_s3, 2048, %s45_s18, [#allocation6], %s478_s11, %s478_s11, %s479_s12  }
  0x32   :  { %473 = dma.done.wait [#allocation4], 128  }
  0x33   :  { %474 = vsyncadd [#allocation4], 4294967168 }
  0x34   :  { %475 = dma.done.wait [#allocation6], 2560  }
  0x35   :  { %476 = vsyncadd [#allocation6], 4294964736  ;;  %v482_v0 = vmov 0.0|0.0   ;;  %vm483_vm0 = vmmov 0   ;;  %v484_v1 = vmov 0.0   ;;  %v68_v2 = vld [vmem:[#allocation5] sm:$0xff]  ;;  %v173_v32 = vlaneseq }
  0x36   :  { %368 = vmatprep.subr.bf16.mxu0 %v482_v0  ;;  %365 = vmatprep.mubr.msk.f32.mxu0 %vm483_vm0, %v484_v1  ;;  %v69_v3 = vld [vmem:[#allocation5 + $0x8] sm:$0xff]  ;;  %v70_v4 = vld [vmem:[#allocation5 + $0x10] sm:$0xff]  ;;  %v71_v6 = vld [vmem:[#allocation5 + $0x18] sm:$0xff]  ;;  %vm79_vm1 = vcmask 261120   ;;  %v485_v25 = vmov 0   ;;  %v324_v53 = vstv %s589_s6  ;;  %vm326_vm2 = vcmask 7168  }
  0x37   :  { %v369_v5 = vpack.c.bf16 %v69_v3, %v68_v2  ;;  %v383_v7 = vld [vmem:[#allocation7 + $0x4] ss:$8 sps:$4 sm:$0xff]   ;;  %v385_v8 = vld [vmem:[#allocation7] ss:$8 sps:$4 sm:$0xff]   ;;  %v372_v9 = vpack.c.bf16 %v71_v6, %v70_v4  ;;  %v386_v10 = vld [vmem:[#allocation7 + $0x14] ss:$8 sps:$4 sm:$0xff]   ;;  %295 = vmatprep.mubr.bf16.mxu1 %v485_v25 }
  0x38   :  { %263 = vmatprep.subr.bf16.mxu1 %v383_v7  ;;  %v388_v11 = vld [vmem:[#allocation7 + $0x10] ss:$8 sps:$4 sm:$0xff]   ;;  %v389_v12 = vld [vmem:[#allocation7 + $0x24] ss:$8 sps:$4 sm:$0xff]   ;;  %v391_v14 = vld [vmem:[#allocation7 + $0x20] ss:$8 sps:$4 sm:$0xff]  }
  0x39   :  { %370 = vmatpush3.bf16.msra.mxu0 %v369_v5  ;;  %264 = vmatpush1.bf16.msra.mxu1 %v385_v8  ;;  %v67_v13 = vld [vmem:[#allocation3] sm:$0xff]  ;;  %v395_v17 = vld [vmem:[#allocation7 + $0x44] ss:$8 sps:$4 sm:$0xff]   ;;  %v397_v18 = vld [vmem:[#allocation7 + $0x40] ss:$8 sps:$4 sm:$0xff]   ;;  %v174_v33 = vshrl.u32 %v173_v32, 7 }
  0x3a   :  { %371 = vmatprep.subr.bf16.mxu0 %v482_v0  ;;  %265 = vmatprep.subr.bf16.mxu1 %v386_v10  ;;  %v392_v15 = vld [vmem:[#allocation7 + $0x34] ss:$8 sps:$4 sm:$0xff]   ;;  %v394_v16 = vld [vmem:[#allocation7 + $0x30] ss:$8 sps:$4 sm:$0xff]   ;;  %v401_v21 = vld [vmem:[#allocation7 + $0x64] ss:$8 sps:$4 sm:$0xff]  }
  0x3b   :  { %v398_v19 = vld [vmem:[#allocation7 + $0x54] ss:$8 sps:$4 sm:$0xff]   ;;  %v400_v20 = vld [vmem:[#allocation7 + $0x50] ss:$8 sps:$4 sm:$0xff]   ;;  %v403_v22 = vld [vmem:[#allocation7 + $0x60] ss:$8 sps:$4 sm:$0xff]  }
  0x3c   :  { %v404_v23 = vld [vmem:[#allocation7 + $0x74] ss:$8 sps:$4 sm:$0xff]   ;;  %v406_v24 = vld [vmem:[#allocation7 + $0x70] ss:$8 sps:$4 sm:$0xff]   ;;  %v175_v34 = vsub.s32 0, %v174_v33  ;;  %v179_v36 = vsub.s32 1, %v174_v33 }
  0x3d   :  { %373 = vmatpush3.bf16.msra.mxu0 %v372_v9  ;;  %266 = vmatpush1.bf16.msra.mxu1 %v388_v11  ;;  %v334_v26 = vld [vmem:[%s585_s2] ss:$0 sm:$0xff] }
  0x3e   :  { %267 = vmatprep.subr.bf16.mxu1 %v389_v12  ;;  %v171_v35 = vld [vmem:[%s587_s4] sm:$0x3] }
  0x3f   :  { %v176_v37 = vrot.slane %v171_v35, %v175_v34  ;;  %v180_v38 = vrot.slane %v171_v35, %v179_v36  ;;  %v306_v39 = vld [vmem:[%s588_s5] sm:$0x3] }
  0x40   :  { %366 = vmatmul.mubr.msk.f32.vlgmr.msra.gmra.mrb[0].mxu0 %vm79_vm1, %v67_v13  ;;  %v311_v43 = vrot.slane %v306_v39, %v175_v34  ;;  %v315_v46 = vrot.slane %v306_v39, %v179_v36 }
  0x41   :  { %268 = vmatpush1.bf16.msra.mxu1 %v391_v14 }
  0x42   :  { %269 = vmatprep.subr.bf16.mxu1 %v392_v15 }
  0x45   :  { %270 = vmatpush1.bf16.msra.mxu1 %v394_v16 }
  0x46   :  { %271 = vmatprep.subr.bf16.mxu1 %v395_v17 }
  0x49   :  { %272 = vmatpush1.bf16.msra.mxu1 %v397_v18 }
  0x4a   :  { %273 = vmatprep.subr.bf16.mxu1 %v398_v19 }
  0x4d   :  { %274 = vmatpush1.bf16.msra.mxu1 %v400_v20 }
  0x4e   :  { %275 = vmatprep.subr.bf16.mxu1 %v401_v21 }
  0x51   :  { %276 = vmatpush1.bf16.msra.mxu1 %v403_v22 }
  0x52   :  { %277 = vmatprep.subr.bf16.mxu1 %v404_v23 }
  0x55   :  { %278 = vmatpush1.bf16.msra.mxu1 %v406_v24 }
 0x113   :  { %v149_v27 = vpop.f32.mrb[0].mxu0 }
 0x114   :  { %v150_v28 = vadd.f32 %v334_v26, %v149_v27  ;;  %v367_v29 = vpop.f32.mrb[1].mxu0 }
 0x116   :  { %v153_v30 = vmax.f32 %v150_v28, 0.0 }
 0x118   :  { %v154_v31 = vpack.c.bf16 %v153_v30, %v153_v30 }
 0x11a   :  { %296 = vmatmul.mubr.bf16.vlgmr.msra.gmra.mrb[0].mxu1 %v154_v31 }
 0x1ed   :  { %v297_v40 = vpop.f32.mrb[0].mxu1 }
 0x1ee   :  { %v298_v41 = vadd.f32 %v297_v40, %v176_v37  ;;  %v299_v42 = vpop.f32.mrb[1].mxu1 }
 0x1ef   :  { %v300_v44 = vadd.f32 %v299_v42, %v180_v38  ;;  %v301_v45 = vpop.f32.mrb[2].mxu1 }
 0x1f0   :  { %v304_v47 = vmax.f32 %v298_v41, 0.0  ;;  %v302_v48 = vpop.f32.mrb[3].mxu1 }
 0x1f1   :  { %v305_v49 = vmax.f32 %v300_v44, 0.0 }
 0x1f2   :  { %v318_v50 = vmul.f32 %v311_v43, %v304_v47 }
 0x1f3   :  { %v319_v51 = vmul.f32 %v315_v46, %v305_v49 }
 0x1f5   :  { %v320_v52 = vadd.f32 %v319_v51, %v318_v50 }
 0x1f7   :  { %321 = vadd.xlane.f32.xlu0 %v320_v52 }
 0x284   :  { %v322_v54 = vpop.xlane.xlu0 %321 }
 0x285   :  { %v325_v55 = vadd.f32 %v324_v53, %v322_v54 }
 0x287   :  { %327 = vst.msk [vmem:[%s590_s7] sm:$0xff] %vm326_vm2, %v325_v55 }
 0x288   :  { %332 = vsyncpa [#allocation4], 1 }
 0x289   :  { %333 = vsyncpa [#allocation6], 1 }

</bundles_post_ra>
